<compile_context>
chip_gen: v5e
topology: v5e:2x2
jax: 0.10.0
libtpu: 0.0.40
codegen_flags: <defaults>
</compile_context>

<pallas_src>
import functools

import jax
import jax.numpy as jnp
from jax.experimental import pallas as pl
from jax.experimental.pallas import tpu as pltpu


_LANE = 128
_ACC_CHUNKS = 4        # accumulator width = tile_l / _ACC_CHUNKS (when possible)


def _dice_sums_kernel(x_ref, y_ref, inter_ref, denom_ref, i_acc, d_acc, *,
                      n_splits, tiles_per_split, n_tiles, rem_cols, acc_w,
                      n_chunks):
    # Grid: (row_blocks, splits, tiles).  The tile axis (reduction) runs last.
    s = pl.program_id(1)
    j = pl.program_id(2)
    g = s * tiles_per_split + j if n_splits > 1 else j   # global L-tile index

    has_rem = rem_cols > 0
    rem_tile = n_tiles - 1
    may_invalid = n_splits * tiles_per_split > n_tiles
    init_may_be_rem = has_rem and (
        (n_splits == 1 and n_tiles == 1)
        or (n_splits > 1 and tiles_per_split == n_tiles - 1))

    def full_update(init):
        # Hot path: unmasked, chunked VPU accumulation (no iota/select).
        for k in range(n_chunks):
            lo = k * acc_w
            x = x_ref[:, lo:lo + acc_w].astype(jnp.float32)
            y = y_ref[:, lo:lo + acc_w].astype(jnp.float32)
            if init and k == 0:
                i_acc[...] = x * y          # overwrite: no zero-init sweep
                d_acc[...] = x + y
            else:
                i_acc[...] += x * y
                d_acc[...] += x + y

    def rem_update(init):
        # Ragged last tile: chunk boundaries are static, so fully out-of-range
        # chunks are dropped at trace time and only the single straddling
        # chunk pays for the lane mask.
        wrote = False
        for k in range(n_chunks):
            lo = k * acc_w
            if lo >= rem_cols:
                break
            x = x_ref[:, lo:lo + acc_w].astype(jnp.float32)
            y = y_ref[:, lo:lo + acc_w].astype(jnp.float32)
            if lo + acc_w > rem_cols:
                lane = jax.lax.broadcasted_iota(jnp.int32, x.shape, 1)
                m = lane < (rem_cols - lo)
                x = jnp.where(m, x, 0.0)
                y = jnp.where(m, y, 0.0)
            if init and not wrote:
                i_acc[...] = x * y
                d_acc[...] = x + y
                wrote = True
            else:
                i_acc[...] += x * y
                d_acc[...] += x + y
        if init and not wrote:              # unreachable (rem_cols >= 1), safe
            i_acc[...] = jnp.zeros_like(i_acc)
            d_acc[...] = jnp.zeros_like(d_acc)

    is_init = j == 0

    # --- first tile of this (row-block, split): overwrite accumulators ---
    if init_may_be_rem:
        @pl.when(jnp.logical_and(is_init, g != rem_tile))
        def _():
            full_update(init=True)

        @pl.when(jnp.logical_and(is_init, g == rem_tile))
        def _():
            rem_update(init=True)
    else:
        @pl.when(is_init)
        def _():
            full_update(init=True)

    # --- subsequent tiles: accumulate (skip split-padding tiles entirely) ---
    if tiles_per_split > 1:
        not_init = j > 0
        if has_rem:
            @pl.when(jnp.logical_and(not_init, g < rem_tile))
            def _():
                full_update(init=False)

            @pl.when(jnp.logical_and(not_init, g == rem_tile))
            def _():
                rem_update(init=False)
            # g > rem_tile only happens on the split-padding tile: skipped.
        elif may_invalid:
            @pl.when(jnp.logical_and(not_init, g < n_tiles))
            def _():
                full_update(init=False)
        else:
            @pl.when(not_init)
            def _():
                full_update(init=False)

    @pl.when(j == tiles_per_split - 1)
    def _():
        # One cross-lane (XLU) reduction per (row-block, split).
        inter_ref[0] = jnp.sum(i_acc[...], axis=-1, keepdims=True)
        denom_ref[0] = jnp.sum(d_acc[...], axis=-1, keepdims=True)


def _sublane_rows(dtype):
    # Full sublane tile per dtype: 8 rows (4B), 16 (2B), 32 (1B).
    return {4: 8, 2: 16, 1: 32}.get(jnp.dtype(dtype).itemsize, 8)


def _vmem_plan():
    """Per-generation VMEM working-set budget and requested scoped limit."""
    try:
        cap = int(pltpu.get_tpu_info().vmem_capacity_bytes)
    except Exception:
        cap = 64 * 1024 * 1024          # v7x per-core physical VMEM (smallest)
    budget = min(int(cap * 0.5), 36 * 1024 * 1024)    # per-step working set
    limit = min(int(cap * 0.75), budget + 16 * 1024 * 1024)
    return budget, limit


def _choose_tile_l(R, L, itemsize, budget_bytes):
    # Exact accounting per lane-column of tile_l (R already equals the sublane
    # tile, so there is no hidden padding):
    #   inputs : 2 arrays x 2 pipeline buffers x R rows x itemsize
    #   scratch: 2 f32 accumulators of width tile_l / _ACC_CHUNKS
    per_col = 4 * R * itemsize + (2 * R * 4) // _ACC_CHUNKS
    t = budget_bytes // max(per_col, 1)
    # ~8 MiB cap per input block: beyond that the ~0.35us/step overhead is
    # fully amortized and larger blocks only add VMEM pressure.
    t = min(t, (8 * 1024 * 1024) // (R * itemsize))
    # Never bigger than L rounded up to a lane tile.
    t = min(t, -(-L // _LANE) * _LANE)
    quantum = _ACC_CHUNKS * _LANE
    if t >= quantum:
        return (t // quantum) * quantum
    return max(_LANE, (t // _LANE) * _LANE)


def dice_coef(x, y, epsilon=1e-5, return_score_per_channel=False, tile_l=None):
    """Pallas equivalent of DiceCoef.forward(input, target)."""
    assert x.shape == y.shape, "'input' and 'target' must have the same shape"
    assert x.ndim >= 2, "expected (N, C, *spatial)"
    N, C = x.shape[0], x.shape[1]
    L = 1
    for d in x.shape[2:]:
        L *= d
    n_rows = N * C

    # Native layout: contiguous reshape only (no transpose, no pad in HBM).
    xf = x.reshape(n_rows, L)
    yf = y.reshape(n_rows, L)

    itemsize = jnp.dtype(x.dtype).itemsize
    R = _sublane_rows(x.dtype)                    # full-sublane row blocks
    budget, vmem_limit = _vmem_plan()
    if tile_l is None:
        tile_l = _choose_tile_l(R, L, itemsize, budget)
    assert tile_l % _LANE == 0, "tile_l must be a multiple of 128"
    n_chunks = _ACC_CHUNKS if tile_l % (_ACC_CHUNKS * _LANE) == 0 else 1
    acc_w = tile_l // n_chunks

    n_full_tiles = L // tile_l
    rem_cols = L - n_full_tiles * tile_l
    n_tiles = n_full_tiles + (1 if rem_cols else 0)

    n_row_blocks = -(-n_rows // R)
    # v7x has two TensorCores: keep an even number of parallel blocks by
    # splitting the L axis in two when the row-block count is odd (e.g. 1).
    n_splits = 2 if (n_tiles >= 2 and n_row_blocks % 2 == 1) else 1
    tiles_per_split = -(-n_tiles // n_splits)

    padded_rows = n_row_blocks * R
    last_tile = n_tiles - 1

    if n_splits * tiles_per_split > n_tiles:
        # Split-padding tiles are clamped to a valid tile (kernel skips them).
        def l_block(r, s, j):
            return (r, jnp.minimum(s * tiles_per_split + j, last_tile))
    elif n_splits > 1:
        def l_block(r, s, j):
            return (r, s * tiles_per_split + j)
    else:
        def l_block(r, s, j):
            return (r, j)

    kernel = functools.partial(
        _dice_sums_kernel,
        n_splits=n_splits, tiles_per_split=tiles_per_split, n_tiles=n_tiles,
        rem_cols=rem_cols, acc_w=acc_w, n_chunks=n_chunks)

    in_bytes = xf.size * itemsize + yf.size * itemsize
    cost = pl.CostEstimate(
        flops=3 * n_rows * L,
        transcendentals=0,
        bytes_accessed=in_bytes + 2 * n_splits * padded_rows * 4)

    inter, denom = pl.pallas_call(
        kernel,
        out_shape=(
            jax.ShapeDtypeStruct((n_splits, padded_rows, 1), jnp.float32),
            jax.ShapeDtypeStruct((n_splits, padded_rows, 1), jnp.float32),
        ),
        grid_spec=pltpu.PrefetchScalarGridSpec(
            num_scalar_prefetch=0,
            grid=(n_row_blocks, n_splits, tiles_per_split),
            in_specs=[
                pl.BlockSpec((R, tile_l), l_block),
                pl.BlockSpec((R, tile_l), l_block),
            ],
            out_specs=(
                pl.BlockSpec((1, R, 1), lambda r, s, j: (s, r, 0)),
                pl.BlockSpec((1, R, 1), lambda r, s, j: (s, r, 0)),
            ),
            scratch_shapes=[
                pltpu.VMEM((R, acc_w), jnp.float32),
                pltpu.VMEM((R, acc_w), jnp.float32),
            ],
        ),
        compiler_params=pltpu.CompilerParams(
            dimension_semantics=("parallel", "parallel", "arbitrary"),
            vmem_limit_bytes=vmem_limit,
        ),
        cost_estimate=cost,
    )(xf, yf)

    # Tiny epilogue in plain JAX: combine split halves, drop padded (garbage)
    # rows, reduce over batch, finish the Dice formula.
    inter = inter.sum(axis=0)[:n_rows, 0].reshape(N, C).sum(axis=0)   # (C,)
    denom = denom.sum(axis=0)[:n_rows, 0].reshape(N, C).sum(axis=0)   # (C,)
    per_channel_dice = (2.0 * inter + epsilon) / (denom + epsilon)
    if return_score_per_channel:
        return per_channel_dice
    return jnp.mean(per_channel_dice)


def _dice_coef_ref(x, y, epsilon=1e-5, return_score_per_channel=False):
    C = x.shape[1]
    axes = (1, 0) + tuple(range(2, x.ndim))
    xf = jnp.transpose(x, axes).reshape(C, -1).astype(jnp.float32)
    yf = jnp.transpose(y, axes).reshape(C, -1).astype(jnp.float32)
    inter = jnp.sum(xf * yf, axis=-1)
    denom = jnp.sum(xf + yf, axis=-1)
    dice = (2.0 * inter + epsilon) / (denom + epsilon)
    if return_score_per_channel:
        return dice
    return jnp.mean(dice)


if __name__ == "__main__":
    key = jax.random.PRNGKey(0)
    k1, k2 = jax.random.split(key)

    # DiceCoef has no learnable parameters; only epsilon=1e-5.
    N, C, H, W = 2, 4, 16, 16
    x = jax.nn.sigmoid(jax.random.normal(k1, (N, C, H, W), dtype=jnp.float32))
    t = (jax.random.uniform(k2, (N, C, H, W)) > 0.5).astype(jnp.float32)

    out = jax.block_until_ready(dice_coef(x, t, epsilon=1e-5))
    ref = _dice_coef_ref(x, t, epsilon=1e-5)
    assert jnp.allclose(out, ref, rtol=1e-5, atol=1e-5), (out, ref)

    out_pc = jax.block_until_ready(
        dice_coef(x, t, epsilon=1e-5, return_score_per_channel=True))
    ref_pc = _dice_coef_ref(x, t, epsilon=1e-5, return_score_per_channel=True)
    assert jnp.allclose(out_pc, ref_pc, rtol=1e-5, atol=1e-5), (out_pc, ref_pc)

    # Ragged L and partial row block (N*C=6 < 8): masked last tile, dropped rows.
    x2 = jax.nn.sigmoid(jax.random.normal(k1, (2, 3, 10, 30), dtype=jnp.float32))
    t2 = (jax.random.uniform(k2, (2, 3, 10, 30)) > 0.5).astype(jnp.float32)
    out2 = jax.block_until_ready(dice_coef(x2, t2))
    ref2 = _dice_coef_ref(x2, t2)
    assert jnp.allclose(out2, ref2, rtol=1e-5, atol=1e-5), (out2, ref2)

    # Multi-tile path with a forced small tile: exercises chunked accumulation,
    # the 2-way L split (odd row-block count) and the ragged remainder tile.
    x3 = jax.nn.sigmoid(jax.random.normal(k1, (1, 4, 7, 97), dtype=jnp.float32))
    t3 = (jax.random.uniform(k2, (1, 4, 7, 97)) > 0.5).astype(jnp.float32)
    out3 = jax.block_until_ready(dice_coef(x3, t3, tile_l=512))
    ref3 = _dice_coef_ref(x3, t3)
    assert jnp.allclose(out3, ref3, rtol=1e-5, atol=1e-5), (out3, ref3)

    # bf16 inputs -> 16-row sublane blocks, f32 accumulation in-kernel.
    xb = x.astype(jnp.bfloat16)
    tb = t.astype(jnp.bfloat16)
    outb = jax.block_until_ready(
        dice_coef(xb, tb, return_score_per_channel=True))
    refb = _dice_coef_ref(xb, tb, return_score_per_channel=True)
    assert jnp.allclose(outb, refb, rtol=1e-4, atol=1e-4), (outb, refb)

    print("KERNEL_OK")
</pallas_src>

<mosaic_0001>
module attributes {stable_mosaic.version = 11 : i64} {
  func.func @_dice_sums_kernel(%arg0: i32, %arg1: i32, %arg2: i32, %arg3: memref<8x256xf32, #tpu.memory_space<vmem>>, %arg4: memref<8x256xf32, #tpu.memory_space<vmem>>, %arg5: memref<1x8x1xf32, #tpu.memory_space<vmem>>, %arg6: memref<1x8x1xf32, #tpu.memory_space<vmem>>, %arg7: memref<8x256xf32, #tpu.memory_space<vmem>>, %arg8: memref<8x256xf32, #tpu.memory_space<vmem>>) attributes {dimension_semantics = [#tpu.dimension_semantics<parallel>, #tpu.dimension_semantics<parallel>, #tpu.dimension_semantics<arbitrary>], iteration_bounds = array<i64: 1, 1, 1>, scalar_prefetch = 0 : i64, scratch_operands = 2 : i64, tpu.core_type = #tpu.core_type<tc>, window_params = [{transform_indices = @transform_0, window_bounds = array<i64: 8, 256>}, {transform_indices = @transform_1, window_bounds = array<i64: 8, 256>}, {transform_indices = @transform_2, window_bounds = array<i64: 1, 8, 1>}, {transform_indices = @transform_3, window_bounds = array<i64: 1, 8, 1>}]} {
    %c0_i32 = arith.constant 0 : i32
    %0 = arith.cmpi eq, %arg2, %c0_i32 : i32
    %1 = arith.extui %0 : i1 to i32
    %c0_i32_0 = arith.constant 0 : i32
    %2 = arith.cmpi ne, %1, %c0_i32_0 : i32
    scf.if %2 {
      %c0 = arith.constant 0 : index
      %c0_3 = arith.constant 0 : index
      %6 = vector.load %arg3[%c0, %c0_3] : memref<8x256xf32, #tpu.memory_space<vmem>>, vector<8x256xf32>
      %c0_4 = arith.constant 0 : index
      %c0_5 = arith.constant 0 : index
      %7 = vector.load %arg4[%c0_4, %c0_5] : memref<8x256xf32, #tpu.memory_space<vmem>>, vector<8x256xf32>
      %8 = arith.mulf %6, %7 : vector<8x256xf32>
      %c0_6 = arith.constant 0 : index
      %c0_7 = arith.constant 0 : index
      %9 = vector.load %arg7[%c0_6, %c0_7] : memref<8x256xf32, #tpu.memory_space<vmem>>, vector<8x256xf32>
      tpu.vector_store %arg7[%c0_6, %c0_7], %8 {strides = array<i32>} : memref<8x256xf32, #tpu.memory_space<vmem>>, vector<8x256xf32>,
      %10 = arith.addf %6, %7 : vector<8x256xf32>
      %c0_8 = arith.constant 0 : index
      %c0_9 = arith.constant 0 : index
      %11 = vector.load %arg8[%c0_8, %c0_9] : memref<8x256xf32, #tpu.memory_space<vmem>>, vector<8x256xf32>
      tpu.vector_store %arg8[%c0_8, %c0_9], %10 {strides = array<i32>} : memref<8x256xf32, #tpu.memory_space<vmem>>, vector<8x256xf32>,
    } else {
    }
    %c0_i32_1 = arith.constant 0 : i32
    %3 = arith.cmpi eq, %arg2, %c0_i32_1 : i32
    %4 = arith.extui %3 : i1 to i32
    %c0_i32_2 = arith.constant 0 : i32
    %5 = arith.cmpi ne, %4, %c0_i32_2 : i32
    scf.if %5 {
      %c0 = arith.constant 0 : index
      %c0_3 = arith.constant 0 : index
      %6 = vector.load %arg7[%c0, %c0_3] : memref<8x256xf32, #tpu.memory_space<vmem>>, vector<8x256xf32>
      %cst = arith.constant dense<0.000000e+00> : vector<8xf32>
      %7 = vector.multi_reduction <add>, %6, %cst [1] : vector<8x256xf32> to vector<8xf32>
      %8 = vector.shape_cast %7 : vector<8xf32> to vector<8x1xf32>
      %c0_4 = arith.constant 0 : index
      %c0_5 = arith.constant 0 : index
      %c0_6 = arith.constant 0 : index
      %9 = vector.load %arg5[%c0_4, %c0_5, %c0_6] : memref<1x8x1xf32, #tpu.memory_space<vmem>>, vector<1x8x1xf32>
      %10 = vector.shape_cast %9 : vector<1x8x1xf32> to vector<8x1xf32>
      %11 = vector.shape_cast %8 : vector<8x1xf32> to vector<1x8x1xf32>
      tpu.vector_store %arg5[%c0_4, %c0_5, %c0_6], %11 {strides = array<i32>} : memref<1x8x1xf32, #tpu.memory_space<vmem>>, vector<1x8x1xf32>,
      %c0_7 = arith.constant 0 : index
      %c0_8 = arith.constant 0 : index
      %12 = vector.load %arg8[%c0_7, %c0_8] : memref<8x256xf32, #tpu.memory_space<vmem>>, vector<8x256xf32>
      %cst_9 = arith.constant dense<0.000000e+00> : vector<8xf32>
      %13 = vector.multi_reduction <add>, %12, %cst_9 [1] : vector<8x256xf32> to vector<8xf32>
      %14 = vector.shape_cast %13 : vector<8xf32> to vector<8x1xf32>
      %c0_10 = arith.constant 0 : index
      %c0_11 = arith.constant 0 : index
      %c0_12 = arith.constant 0 : index
      %15 = vector.load %arg6[%c0_10, %c0_11, %c0_12] : memref<1x8x1xf32, #tpu.memory_space<vmem>>, vector<1x8x1xf32>
      %16 = vector.shape_cast %15 : vector<1x8x1xf32> to vector<8x1xf32>
      %17 = vector.shape_cast %14 : vector<8x1xf32> to vector<1x8x1xf32>
      tpu.vector_store %arg6[%c0_10, %c0_11, %c0_12], %17 {strides = array<i32>} : memref<1x8x1xf32, #tpu.memory_space<vmem>>, vector<1x8x1xf32>,
    } else {
    }
    return
  }
  func.func @transform_0(%arg0: i32, %arg1: i32, %arg2: i32) -> (i32, i32) {
    %c0_i32 = arith.constant 0 : i32
    return %arg0, %arg2 : i32, i32
  }
  func.func @transform_1(%arg0: i32, %arg1: i32, %arg2: i32) -> (i32, i32) {
    %c0_i32 = arith.constant 0 : i32
    return %arg0, %arg2 : i32, i32
  }
  func.func @transform_2(%arg0: i32, %arg1: i32, %arg2: i32) -> (i32, i32, i32) {
    %c0_i32 = arith.constant 0 : i32
    %c0_i32_0 = arith.constant 0 : i32
    return %arg1, %arg0, %c0_i32 : i32, i32, i32
  }
  func.func @transform_3(%arg0: i32, %arg1: i32, %arg2: i32) -> (i32, i32, i32) {
    %c0_i32 = arith.constant 0 : i32
    %c0_i32_0 = arith.constant 0 : i32
    return %arg1, %arg0, %c0_i32 : i32, i32, i32
  }
}

</mosaic_0001>

<bundles_post_ra>
// kernel: tpu_custom_call.1
= control target key start
LH: loop header
LB: loop body
LE: loop exit
PB: predicated region body
PF: predicated region fallthrough
CT: control target
= control target key end

     0   :  { %9 = vsyncpa [#allocation5], 0  ;;  %s168_s0 = inlined_call_operand.hbm [shape: f32[8,256], index: 0, kind: input, shape index: {}]   ;;  %s169_s1 = inlined_call_operand.hbm [shape: f32[8,256], index: 1, kind: input, shape index: {}]   ;;  %s170_s2 = inlined_call_operand.vmem [shape: f32[1,8,1], index: 2, kind: output, shape index: {0}]   ;;  %s171_s3 = inlined_call_operand.vmem [shape: f32[1,8,1], index: 3, kind: output, shape index: {1}]  }
   0x1   :  { %s16_s14 = sshll.u32 %s168_s0, 4  ;;  %s17_s14 = int_to_ptr.hbm [resolvable:$true] %s16_s14 }
   0x2   :  { %10 = vsyncpa [#allocation7], 0  ;;  %s134_s15 = smov [#allocation4]   ;;  %s27_s19 = sshll.u32 %s169_s1, 4  ;;  %s28_s19 = int_to_ptr.hbm [resolvable:$true] %s27_s19 }
   0x3   :  { %s18_s16 = sshll.u32 %s134_s15, 4  ;;  %s135_s20 = smov [#allocation6]   ;;  %s19_s16 = int_to_ptr.vmem [resolvable:$true] %s18_s16 }
   0x4   :  { %21 = dma.hbm_to_vmem [thread:$0]  %s17_s14, 256, %s19_s16, [#allocation5]  }
   0x5   :  { %s29_s21 = sshll.u32 %s135_s20, 4  ;;  %s30_s21 = int_to_ptr.vmem [resolvable:$true] %s29_s21 }
   0x6   :  { %32 = dma.hbm_to_vmem [thread:$0]  %s28_s19, 256, %s30_s21, [#allocation7]  }
   0x7   :  { %130 = dma.done.wait [#allocation5], 256  }
   0x8   :  { %131 = vsyncadd [#allocation5], 4294967040 }
   0x9   :  { %132 = dma.done.wait [#allocation7], 256  }
   0xa   :  { %133 = vsyncadd [#allocation7], 4294967040  ;;  %v45_v0 = vld [vmem:[#allocation4] sm:$0xff]  ;;  %v46_v1 = vld [vmem:[#allocation4 + $0x8] sm:$0xff]  ;;  %vm62_vm0 = vcmask 7168  }
   0xb   :  { %v47_v2 = vld [vmem:[#allocation6] sm:$0xff]  ;;  %v48_v3 = vld [vmem:[#allocation6 + $0x8] sm:$0xff] }
   0xc   :  { %v49_v4 = vmul.f32 %v47_v2, %v45_v0  ;;  %v50_v5 = vmul.f32 %v48_v3, %v46_v1  ;;  %v53_v7 = vadd.f32 %v47_v2, %v45_v0  ;;  %v54_v8 = vadd.f32 %v48_v3, %v46_v1 }
   0xe   :  { %v59_v6 = vadd.f32 %v50_v5, %v49_v4  ;;  %v66_v9 = vadd.f32 %v54_v8, %v53_v7 }
  0x10   :  { %60 = vadd.xlane.f32.xlu0 %v59_v6 }
  0x18   :  { %67 = vadd.xlane.f32.xlu0 %v66_v9 }
  0x83   :  { %v61_v10 = vpop.xlane.xlu0 %60 }
  0x84   :  { %63 = vst.msk [vmem:[%s170_s2] sm:$0xff] %vm62_vm0, %v61_v10 }
  0x8b   :  { %v68_v11 = vpop.xlane.xlu0 %67 }
  0x8c   :  { %69 = vst.msk [vmem:[%s171_s3] sm:$0xff] %vm62_vm0, %v68_v11 }
  0x8d   :  { %78 = vsyncpa [#allocation5], 1 }
  0x8e   :  { %79 = vsyncpa [#allocation7], 1 }

</bundles_post_ra>
